<compile_context>
chip_gen: v5e
topology: v5e:2x2
jax: 0.10.0
libtpu: 0.0.40
codegen_flags: <defaults>
</compile_context>

<pallas_src>
import jax
import jax.numpy as jnp
from jax.experimental import pallas as pl
from jax.experimental.pallas import tpu as pltpu


def critic_kernel(s_ref, a_ref, w1s_ref, w1a_ref, b1_ref,
                  w2_ref, b2_ref, wq_ref, bq_ref, q_ref):
    # In-kernel f32 -> bf16 cast of the activation tiles (VPU, hidden under MXU).
    s = s_ref[...].astype(jnp.bfloat16)
    a = a_ref[...].astype(jnp.bfloat16)

    # fc1 (+ fused concat): h1 = state @ W1_s + action @ W1_a + b1, then relu.
    h1 = jnp.dot(s, w1s_ref[...], preferred_element_type=jnp.float32)
    h1 = h1 + jnp.dot(a, w1a_ref[...], preferred_element_type=jnp.float32)
    h1 = jnp.maximum(h1 + b1_ref[...], 0.0)

    # fc2 + relu (bf16 operands, f32 accumulation).
    h2 = jnp.dot(h1.astype(jnp.bfloat16), w2_ref[...],
                 preferred_element_type=jnp.float32)
    h2 = jnp.maximum(h2 + b2_ref[...], 0.0)

    # q head (fc2_dims -> 1), computed lane-dense:
    #   (1, 256) @ (TB, 256)^T -> (1, TB)   (same contraction pattern as q @ k.T)
    q_row = jax.lax.dot_general(
        wq_ref[...], h2.astype(jnp.bfloat16),
        dimension_numbers=(((1,), (1,)), ((), ())),
        preferred_element_type=jnp.float32)
    q_ref[...] = (q_row + bq_ref[...])[None].astype(q_ref.dtype)   # (1, 1, TB)


def _round_up(x, m):
    return (x + m - 1) // m * m


def _choose_batch_tile(B):
    """Batch tile: multiple of 8; large tiles to amortize per-step overhead,
    but >= 2 grid steps for big batches so v7x megacore can shard the batch axis."""
    if B <= 512:
        return _round_up(B, 8)
    return min(2048, _round_up(pl.cdiv(B, 2), 256))


def critic_forward(state, action, params):
    """state: [B, input_dims] f32, action: [B, n_actions] f32 -> q: [B, 1] f32."""
    w1s, w1a, b1, w2, b2, wq, bq = params
    B, d_s = state.shape
    d_a = action.shape[1]
    h1_dim = w1s.shape[1]
    h2_dim = w2.shape[1]

    TB = _choose_batch_tile(B)
    num_tiles = pl.cdiv(B, TB)          # partial last block handled by Pallas

    def batch_spec(d):
        return pl.BlockSpec((TB, d), lambda i: (i, 0))

    def resident(shape):
        # Same block for every grid step -> weights/biases stay VMEM-resident.
        return pl.BlockSpec(shape, lambda i: (0,) * len(shape))

    flops = 2 * num_tiles * TB * (d_s * h1_dim + d_a * h1_dim
                                  + h1_dim * h2_dim + h2_dim)
    bytes_accessed = int(
        state.size * 4 + action.size * 4
        + (w1s.size + w1a.size + w2.size + wq.size) * 2
        + (b1.size + b2.size + bq.size) * 4
        + num_tiles * TB * 4)

    q_tiles = pl.pallas_call(
        critic_kernel,
        out_shape=jax.ShapeDtypeStruct((num_tiles, 1, TB), jnp.float32),
        grid=(num_tiles,),
        in_specs=[
            batch_spec(d_s), batch_spec(d_a),
            resident(w1s.shape), resident(w1a.shape), resident(b1.shape),
            resident(w2.shape), resident(b2.shape),
            resident(wq.shape), resident(bq.shape),
        ],
        out_specs=pl.BlockSpec((1, 1, TB), lambda i: (i, 0, 0)),
        compiler_params=pltpu.CompilerParams(
            dimension_semantics=("parallel",),
            vmem_limit_bytes=32 * 1024 * 1024),
        cost_estimate=pl.CostEstimate(
            flops=flops, transcendentals=0, bytes_accessed=bytes_accessed),
    )(state, action, w1s, w1a, b1, w2, b2, wq, bq)

    # Lane-dense (num_tiles, 1, TB) -> (B, 1); padded-tail junk rows dropped here.
    return q_tiles.reshape(-1)[:B].reshape(B, 1)


def init_params(key, input_dims, n_actions, fc1_dims=256, fc2_dims=256):
    """PyTorch-style uniform(-1/sqrt(fan_in), 1/sqrt(fan_in)) init.

    fc1's weight is split row-wise into state / action parts so the kernel can
    fuse the concat.  MXU weights stored bf16; biases in f32.
    """
    def uniform(key, shape, fan_in):
        bound = 1.0 / jnp.sqrt(float(fan_in))
        return jax.random.uniform(key, shape, jnp.float32, -bound, bound)

    k1s, k1a, k1b, k2w, k2b, kqw, kqb = jax.random.split(key, 7)
    fan1 = input_dims + n_actions
    w1s = uniform(k1s, (input_dims, fc1_dims), fan1).astype(jnp.bfloat16)
    w1a = uniform(k1a, (n_actions, fc1_dims), fan1).astype(jnp.bfloat16)
    b1 = uniform(k1b, (1, fc1_dims), fan1)
    w2 = uniform(k2w, (fc1_dims, fc2_dims), fc1_dims).astype(jnp.bfloat16)
    b2 = uniform(k2b, (1, fc2_dims), fc1_dims)
    wq = uniform(kqw, (1, fc2_dims), fc2_dims).astype(jnp.bfloat16)  # q-head row
    bq = uniform(kqb, (1, 1), fc2_dims)
    return (w1s, w1a, b1, w2, b2, wq, bq)


if __name__ == "__main__":
    key = jax.random.PRNGKey(0)
    k_state, k_action, k_params = jax.random.split(key, 3)

    batch = 2
    input_dims = 16
    n_actions = 4

    state = jax.random.normal(k_state, (batch, input_dims), jnp.float32)
    action = jax.random.normal(k_action, (batch, n_actions), jnp.float32)
    params = init_params(k_params, input_dims, n_actions)

    q = critic_forward(state, action, params)
    q = jax.block_until_ready(q)

    # Reference in plain JAX with the same bf16-operand / f32-accumulate math.
    w1s, w1a, b1, w2, b2, wq, bq = params
    s_bf = state.astype(jnp.bfloat16)
    a_bf = action.astype(jnp.bfloat16)
    h1 = jnp.dot(s_bf, w1s, preferred_element_type=jnp.float32) \
        + jnp.dot(a_bf, w1a, preferred_element_type=jnp.float32)
    h1 = jnp.maximum(h1 + b1, 0.0)
    h2 = jnp.dot(h1.astype(jnp.bfloat16), w2, preferred_element_type=jnp.float32)
    h2 = jnp.maximum(h2 + b2, 0.0)
    ref = jnp.dot(h2.astype(jnp.bfloat16), wq.T,
                  preferred_element_type=jnp.float32) + bq

    assert q.shape == (batch, 1)
    assert jnp.allclose(q, ref, atol=2e-2, rtol=2e-2), (
        f"max abs diff {float(jnp.max(jnp.abs(q - ref)))}")

    print("KERNEL_OK")
</pallas_src>

<mosaic_0001>
module attributes {stable_mosaic.version = 11 : i64} {
  func.func @critic_kernel(%arg0: i32, %arg1: memref<8x16xf32, #tpu.memory_space<vmem>>, %arg2: memref<8x4xf32, #tpu.memory_space<vmem>>, %arg3: memref<16x256xbf16, #tpu.memory_space<vmem>>, %arg4: memref<4x256xbf16, #tpu.memory_space<vmem>>, %arg5: memref<1x256xf32, #tpu.memory_space<vmem>>, %arg6: memref<256x256xbf16, #tpu.memory_space<vmem>>, %arg7: memref<1x256xf32, #tpu.memory_space<vmem>>, %arg8: memref<1x256xbf16, #tpu.memory_space<vmem>>, %arg9: memref<1x1xf32, #tpu.memory_space<vmem>>, %arg10: memref<1x1x8xf32, #tpu.memory_space<vmem>>) attributes {dimension_semantics = [#tpu.dimension_semantics<parallel>], iteration_bounds = array<i64: 1>, scalar_prefetch = 0 : i64, scratch_operands = 0 : i64, tpu.core_type = #tpu.core_type<tc>, window_params = [{transform_indices = @transform_0, window_bounds = array<i64: 8, 16>}, {transform_indices = @transform_1, window_bounds = array<i64: 8, 4>}, {pipeline_mode = #tpu.pipeline_mode<synchronous>, transform_indices = @transform_2, window_bounds = array<i64: 16, 256>}, {pipeline_mode = #tpu.pipeline_mode<synchronous>, transform_indices = @transform_3, window_bounds = array<i64: 4, 256>}, {pipeline_mode = #tpu.pipeline_mode<synchronous>, transform_indices = @transform_4, window_bounds = array<i64: 1, 256>}, {pipeline_mode = #tpu.pipeline_mode<synchronous>, transform_indices = @transform_5, window_bounds = array<i64: 256, 256>}, {pipeline_mode = #tpu.pipeline_mode<synchronous>, transform_indices = @transform_6, window_bounds = array<i64: 1, 256>}, {pipeline_mode = #tpu.pipeline_mode<synchronous>, transform_indices = @transform_7, window_bounds = array<i64: 1, 256>}, {pipeline_mode = #tpu.pipeline_mode<synchronous>, transform_indices = @transform_8, window_bounds = array<i64: 1, 1>}, {transform_indices = @transform_9, window_bounds = array<i64: 1, 1, 8>}]} {
    %c0 = arith.constant 0 : index
    %c0_0 = arith.constant 0 : index
    %0 = vector.load %arg1[%c0, %c0_0] : memref<8x16xf32, #tpu.memory_space<vmem>>, vector<8x16xf32>
    %1 = arith.truncf %0 : vector<8x16xf32> to vector<8x16xbf16>
    %c0_1 = arith.constant 0 : index
    %c0_2 = arith.constant 0 : index
    %2 = vector.load %arg2[%c0_1, %c0_2] : memref<8x4xf32, #tpu.memory_space<vmem>>, vector<8x4xf32>
    %3 = arith.truncf %2 : vector<8x4xf32> to vector<8x4xbf16>
    %c0_3 = arith.constant 0 : index
    %c0_4 = arith.constant 0 : index
    %4 = vector.load %arg3[%c0_3, %c0_4] : memref<16x256xbf16, #tpu.memory_space<vmem>>, vector<16x256xbf16>
    %cst = arith.constant dense<0.000000e+00> : vector<8x256xf32>
    %5 = tpu.matmul %1, %4, %cst {dimension_numbers = #tpu.dot_dimension_numbers<[1], [0], [0], [1], [0, 0, 1, 1], [], []>} : vector<8x16xbf16>, vector<16x256xbf16>, vector<8x256xf32> -> vector<8x256xf32>
    %c0_5 = arith.constant 0 : index
    %c0_6 = arith.constant 0 : index
    %6 = vector.load %arg4[%c0_5, %c0_6] : memref<4x256xbf16, #tpu.memory_space<vmem>>, vector<4x256xbf16>
    %cst_7 = arith.constant dense<0.000000e+00> : vector<8x256xf32>
    %7 = tpu.matmul %3, %6, %cst_7 {dimension_numbers = #tpu.dot_dimension_numbers<[1], [0], [0], [1], [0, 0, 1, 1], [], []>} : vector<8x4xbf16>, vector<4x256xbf16>, vector<8x256xf32> -> vector<8x256xf32>
    %8 = arith.addf %5, %7 : vector<8x256xf32>
    %c0_8 = arith.constant 0 : index
    %c0_9 = arith.constant 0 : index
    %9 = vector.load %arg5[%c0_8, %c0_9] : memref<1x256xf32, #tpu.memory_space<vmem>>, vector<1x256xf32>
    %10 = vector.broadcast %9 : vector<1x256xf32> to vector<8x256xf32>
    %11 = arith.addf %8, %10 : vector<8x256xf32>
    %cst_10 = arith.constant 0.000000e+00 : f32
    %12 = vector.broadcast %cst_10 : f32 to vector<8x256xf32>
    %13 = arith.maximumf %11, %12 : vector<8x256xf32>
    %14 = arith.truncf %13 : vector<8x256xf32> to vector<8x256xbf16>
    %c0_11 = arith.constant 0 : index
    %c0_12 = arith.constant 0 : index
    %15 = vector.load %arg6[%c0_11, %c0_12] : memref<256x256xbf16, #tpu.memory_space<vmem>>, vector<256x256xbf16>
    %cst_13 = arith.constant dense<0.000000e+00> : vector<8x256xf32>
    %16 = tpu.matmul %14, %15, %cst_13 {dimension_numbers = #tpu.dot_dimension_numbers<[1], [0], [0], [1], [0, 0, 1, 1], [], []>} : vector<8x256xbf16>, vector<256x256xbf16>, vector<8x256xf32> -> vector<8x256xf32>
    %c0_14 = arith.constant 0 : index
    %c0_15 = arith.constant 0 : index
    %17 = vector.load %arg7[%c0_14, %c0_15] : memref<1x256xf32, #tpu.memory_space<vmem>>, vector<1x256xf32>
    %18 = vector.broadcast %17 : vector<1x256xf32> to vector<8x256xf32>
    %19 = arith.addf %16, %18 : vector<8x256xf32>
    %cst_16 = arith.constant 0.000000e+00 : f32
    %20 = vector.broadcast %cst_16 : f32 to vector<8x256xf32>
    %21 = arith.maximumf %19, %20 : vector<8x256xf32>
    %c0_17 = arith.constant 0 : index
    %c0_18 = arith.constant 0 : index
    %22 = vector.load %arg8[%c0_17, %c0_18] : memref<1x256xbf16, #tpu.memory_space<vmem>>, vector<1x256xbf16>
    %23 = arith.truncf %21 : vector<8x256xf32> to vector<8x256xbf16>
    %cst_19 = arith.constant dense<0.000000e+00> : vector<1x8xf32>
    %24 = tpu.matmul %22, %23, %cst_19 {dimension_numbers = #tpu.dot_dimension_numbers<[1], [1], [0], [0], [0, 0, 1, 0], [], []>} : vector<1x256xbf16>, vector<8x256xbf16>, vector<1x8xf32> -> vector<1x8xf32>
    %c0_20 = arith.constant 0 : index
    %c0_21 = arith.constant 0 : index
    %25 = vector.load %arg9[%c0_20, %c0_21] : memref<1x1xf32, #tpu.memory_space<vmem>>, vector<1x1xf32>
    %26 = vector.broadcast %25 : vector<1x1xf32> to vector<1x8xf32>
    %27 = arith.addf %24, %26 : vector<1x8xf32>
    %28 = vector.shape_cast %27 : vector<1x8xf32> to vector<1x1x8xf32>
    %c0_22 = arith.constant 0 : index
    %c0_23 = arith.constant 0 : index
    %c0_24 = arith.constant 0 : index
    %29 = vector.load %arg10[%c0_22, %c0_23, %c0_24] : memref<1x1x8xf32, #tpu.memory_space<vmem>>, vector<1x1x8xf32>
    tpu.vector_store %arg10[%c0_22, %c0_23, %c0_24], %28 {strides = array<i32>} : memref<1x1x8xf32, #tpu.memory_space<vmem>>, vector<1x1x8xf32>,
    return
  }
  func.func @transform_0(%arg0: i32) -> (i32, i32) {
    %c0_i32 = arith.constant 0 : i32
    %c0_i32_0 = arith.constant 0 : i32
    return %arg0, %c0_i32 : i32, i32
  }
  func.func @transform_1(%arg0: i32) -> (i32, i32) {
    %c0_i32 = arith.constant 0 : i32
    %c0_i32_0 = arith.constant 0 : i32
    return %arg0, %c0_i32 : i32, i32
  }
  func.func @transform_2(%arg0: i32) -> (i32, i32) {
    %c0_i32 = arith.constant 0 : i32
    %c0_i32_0 = arith.constant 0 : i32
    %c0_i32_1 = arith.constant 0 : i32
    return %c0_i32, %c0_i32_0 : i32, i32
  }
  func.func @transform_3(%arg0: i32) -> (i32, i32) {
    %c0_i32 = arith.constant 0 : i32
    %c0_i32_0 = arith.constant 0 : i32
    %c0_i32_1 = arith.constant 0 : i32
    return %c0_i32, %c0_i32_0 : i32, i32
  }
  func.func @transform_4(%arg0: i32) -> (i32, i32) {
    %c0_i32 = arith.constant 0 : i32
    %c0_i32_0 = arith.constant 0 : i32
    %c0_i32_1 = arith.constant 0 : i32
    return %c0_i32, %c0_i32_0 : i32, i32
  }
  func.func @transform_5(%arg0: i32) -> (i32, i32) {
    %c0_i32 = arith.constant 0 : i32
    %c0_i32_0 = arith.constant 0 : i32
    %c0_i32_1 = arith.constant 0 : i32
    return %c0_i32, %c0_i32_0 : i32, i32
  }
  func.func @transform_6(%arg0: i32) -> (i32, i32) {
    %c0_i32 = arith.constant 0 : i32
    %c0_i32_0 = arith.constant 0 : i32
    %c0_i32_1 = arith.constant 0 : i32
    return %c0_i32, %c0_i32_0 : i32, i32
  }
  func.func @transform_7(%arg0: i32) -> (i32, i32) {
    %c0_i32 = arith.constant 0 : i32
    %c0_i32_0 = arith.constant 0 : i32
    %c0_i32_1 = arith.constant 0 : i32
    return %c0_i32, %c0_i32_0 : i32, i32
  }
  func.func @transform_8(%arg0: i32) -> (i32, i32) {
    %c0_i32 = arith.constant 0 : i32
    %c0_i32_0 = arith.constant 0 : i32
    %c0_i32_1 = arith.constant 0 : i32
    return %c0_i32, %c0_i32_0 : i32, i32
  }
  func.func @transform_9(%arg0: i32) -> (i32, i32, i32) {
    %c0_i32 = arith.constant 0 : i32
    %c0_i32_0 = arith.constant 0 : i32
    %c0_i32_1 = arith.constant 0 : i32
    return %arg0, %c0_i32, %c0_i32_0 : i32, i32, i32
  }
}

</mosaic_0001>

<bundles_post_ra>
// kernel: tpu_custom_call.1
= control target key start
LH: loop header
LB: loop body
LE: loop exit
PB: predicated region body
PF: predicated region fallthrough
CT: control target
= control target key end

     0   :  { %s960_s0 = inlined_call_operand.hbm [shape: f32[2,16], index: 0, kind: input, shape index: {}]   ;;  %s961_s1 = inlined_call_operand.hbm [shape: f32[2,4], index: 1, kind: input, shape index: {}]   ;;  %s962_s2 = inlined_call_operand.hbm [shape: bf16[16,256], index: 2, kind: input, shape index: {}]   ;;  %s963_s3 = inlined_call_operand.vmem [shape: bf16[4,256], index: 3, kind: input, shape index: {}]   ;;  %s964_s4 = inlined_call_operand.hbm [shape: f32[1,256], index: 4, kind: input, shape index: {}]   ;;  %s965_s5 = inlined_call_operand.hbm [shape: bf16[256,256], index: 5, kind: input, shape index: {}]   ;;  %s966_s6 = inlined_call_operand.vmem [shape: f32[1,256], index: 6, kind: input, shape index: {}]   ;;  %s967_s7 = inlined_call_operand.vmem [shape: bf16[1,256], index: 7, kind: input, shape index: {}]   ;;  %s968_s8 = inlined_call_operand.<no memory space> [shape: f32[1,1], index: 8, kind: input, shape index: {}]   ;;  %s969_s9 = inlined_call_operand.hbm [shape: f32[1,1,8], index: 9, kind: output, shape index: {}]  }
   0x1   :  { %v14_v0 = vstv %s968_s8 }
   0x2   :  { %15 = vst [vmem:[#allocation2] sm:$0x1] %v14_v0 }
   0x3   :  { %16 = vsyncpa [#allocation4], 0 }
   0x4   :  { %17 = vsyncpa [#allocation7], 0 }
   0x5   :  { %18 = vsyncpa [#allocation10], 0 }
   0x6   :  { %19 = vsyncpa [#allocation5], 0 }
   0x7   :  { %23 = vsyncadd [#allocation4], 96  ;;  %s24_s13 = sshll.u32 %s960_s0, 4  ;;  %s863_s14 = smov [#allocation3]   ;;  %s25_s13 = int_to_ptr.hbm [resolvable:$true] %s24_s13 }
   0x8   :  { %s26_s15 = sshll.u32 %s863_s14, 4  ;;  %s864_s16 = smov 32   ;;  %s27_s15 = int_to_ptr.vmem [resolvable:$true] %s26_s15 }
   0x9   :  { %s865_s17 = smov 2  }
   0xa   :  { %32 = dma.hbm_to_vmem [thread:$0]  %s25_s13, 32, %s27_s15, [#allocation4], %s864_s16, %s864_s16, %s865_s17  }
   0xb   :  { %36 = vsyncadd [#allocation7], 96  ;;  %s37_s19 = sshll.u32 %s961_s1, 4  ;;  %s866_s20 = smov [#allocation6]   ;;  %s38_s19 = int_to_ptr.hbm [resolvable:$true] %s37_s19 }
   0xc   :  { %s39_s21 = sshll.u32 %s866_s20, 4  ;;  %s66_s0 = sshll.u32 %s964_s4, 4  ;;  %s40_s21 = int_to_ptr.vmem [resolvable:$true] %s39_s21  ;;  %s67_s0 = int_to_ptr.hbm [resolvable:$true] %s66_s0 }
   0xd   :  { %45 = dma.hbm_to_vmem [thread:$0]  %s38_s19, 32, %s40_s21, [#allocation7], %s864_s16, %s864_s16, %s865_s17  }
   0xe   :  { %s867_s24 = smov [#allocation9]   ;;  %s50_s28 = sshll.u32 %s962_s2, 4  ;;  %s51_s28 = int_to_ptr.hbm [resolvable:$true] %s50_s28 }
   0xf   :  { %s68_s25 = sshll.u32 %s867_s24, 4  ;;  %s868_s1 = smov [#allocation8]   ;;  %s69_s25 = int_to_ptr.vmem [resolvable:$true] %s68_s25 }
  0x10   :  { %71 = dma.hbm_to_vmem [thread:$0]  %s67_s0, 32, %s69_s25, [#allocation10]  }
  0x11   :  { %s52_s29 = sshll.u32 %s868_s1, 4  ;;  %s76_s11 = sshll.u32 %s965_s5, 4  ;;  %s53_s29 = int_to_ptr.vmem [resolvable:$true] %s52_s29  ;;  %s77_s11 = int_to_ptr.hbm [resolvable:$true] %s76_s11 }
  0x12   :  { %s869_s12 = smov 128   ;;  %s870_s4 = smov 8  }
  0x13   :  { %58 = dma.hbm_to_vmem [thread:$0]  %s51_s28, 256, %s53_s29, [#allocation7], %s869_s12, %s869_s12, %s870_s4  }
  0x14   :  { %s871_s13 = smov [#allocation11]  }
  0x15   :  { %s78_s14 = sshll.u32 %s871_s13, 4  ;;  %s79_s14 = int_to_ptr.vmem [resolvable:$true] %s78_s14 }
  0x16   :  { %84 = dma.hbm_to_vmem [thread:$0]  %s77_s11, 4096, %s79_s14, [#allocation10], %s869_s12, %s869_s12, %s870_s4  }
  0x17   :  { %855 = dma.done.wait [#allocation4], 128  }
  0x18   :  { %856 = vsyncadd [#allocation4], 4294967168 }
  0x19   :  { %857 = dma.done.wait [#allocation7], 384  }
  0x1a   :  { %858 = vsyncadd [#allocation7], 4294966912 }
  0x1b   :  { %859 = dma.done.wait [#allocation10], 4128  }
  0x1c   :  { %860 = vsyncadd [#allocation10], 4294963168  ;;  %v529_v1 = vld [vmem:[#allocation8] sm:$0xf]  ;;  %v666_v2 = vld [vmem:[#allocation8 + $0x4] sm:$0xf0] }
  0x1d   :  { %v665_v3 = vld [vmem:[#allocation8 + $0x4] sm:$0xf]  ;;  %v530_v4 = vor.u32 %v666_v2, %v529_v1  ;;  %v531_v5 = vld [vmem:[#allocation8 + $0x8] sm:$0xf0]  ;;  %v112_v6 = vld [vmem:[#allocation3] sm:$0xff]  ;;  %vm168_vm0 = vcmask 130048  }
  0x1e   :  { %v118_v7 = vld [vmem:[%s963_s3] sm:$0xf]  ;;  %v534_v8 = vor.u32 %v665_v3, %v531_v5  ;;  %v113_v9 = vpack.c.bf16 %v112_v6, %v112_v6  ;;  %v595_v10 = vld [vmem:[#allocation11 + $0x70] sm:$0xf]  ;;  %v597_v14 = vld [vmem:[#allocation11 + $0x78] sm:$0xf0] }
  0x1f   :  { %120 = vst [vmem:[#allocation1] ss:$4 sm:$0xff] %v118_v7  ;;  %179 = vmatpush.bf16.msra.mxu2 %v530_v4  ;;  %v682_v11 = vld [vmem:[#allocation11 + $0x74] sm:$0xf0]  ;;  %v659_v12 = vld [vmem:[#allocation11 + $0xf0] sm:$0xf] }
  0x20   :  { %192 = vmatpush.bf16.msra.mxu3 %v534_v8  ;;  %v681_v13 = vld [vmem:[#allocation11 + $0x74] sm:$0xf]  ;;  %v698_v15 = vld [vmem:[#allocation11 + $0xf4] sm:$0xf0]  ;;  %v661_v18 = vld [vmem:[#allocation11 + $0xf8] sm:$0xf0]  ;;  %v596_v27 = vor.u32 %v682_v11, %v595_v10 }
  0x21   :  { %v600_v16 = vor.u32 %v681_v13, %v597_v14  ;;  %v697_v17 = vld [vmem:[#allocation11 + $0xf4] sm:$0xf]  ;;  %vm127_vm1 = vcmask 1041408   ;;  %v114_v20 = vld [vmem:[#allocation6] sm:$0xff]  ;;  %v587_v22 = vld [vmem:[#allocation11 + $0x60] sm:$0xf]  ;;  %v660_v28 = vor.u32 %v698_v15, %v659_v12 }
  0x22   :  { %535 = vmatmul.msk.bf16.vlgmr.msra.gmra.mxu2 %vm168_vm0, %v113_v9  ;;  %v462_v19 = vld [vmem:[%s967_s7] sm:$0x3]  ;;  %v664_v21 = vor.u32 %v697_v17, %v661_v18  ;;  %v680_v23 = vld [vmem:[#allocation11 + $0x64] sm:$0xf0]  ;;  %v679_v24 = vld [vmem:[#allocation11 + $0x64] sm:$0xf]  ;;  %v115_v38 = vpack.c.bf16 %v114_v20, %v114_v20 }
  0x23   :  { %536 = vmatmul.msk.bf16.vlgmr.msra.gmra.mxu3 %vm168_vm0, %v113_v9  ;;  %434 = vmatpush.bf16.msrb.mxu2 %v600_v16  ;;  %v589_v25 = vld [vmem:[#allocation11 + $0x68] sm:$0xf0]  ;;  %v695_v26 = vld [vmem:[#allocation11 + $0xe4] sm:$0xf]  ;;  %v651_v29 = vld [vmem:[#allocation11 + $0xe0] sm:$0xf]  ;;  %v588_v41 = vor.u32 %v680_v23, %v587_v22 }
  0x24   :  { %447 = vmatpush.bf16.msrb.mxu3 %v664_v21  ;;  %v696_v30 = vld [vmem:[#allocation11 + $0xe4] sm:$0xf0]  ;;  %v653_v31 = vld [vmem:[#allocation11 + $0xe8] sm:$0xf0]  ;;  %v592_v34 = vor.u32 %v679_v24, %v589_v25  ;;  %vm123_vm2 = vcmask 31744   ;;  %s513_s19 = sshll.u32 %s969_s9, 4  ;;  %s514_s19 = int_to_ptr.hbm [resolvable:$true] %s513_s19 }
  0x25   :  { %v656_v35 = vor.u32 %v695_v26, %v653_v31  ;;  %v677_v39 = vld [vmem:[#allocation11 + $0x54] sm:$0xf]  ;;  %v581_v40 = vld [vmem:[#allocation11 + $0x58] sm:$0xf0]  ;;  %v652_v42 = vor.u32 %v696_v30, %v651_v29  ;;  %v579_v43 = vld [vmem:[#allocation11 + $0x50] sm:$0xf] }
  0x26   :  { %v121_v32 = vld.sshfl [vmem:[#allocation1] sm:$0xff pattern:$0x73625140]  ;;  %v122_v33 = vld.sshfl [vmem:[#allocation1 + $0x8] sm:$0xff pattern:$0x73625140]  ;;  %v584_v49 = vor.u32 %v677_v39, %v581_v40 }
  0x27   :  { %v128_v36 = vsel %vm127_vm1, %v121_v32, 0  ;;  %v130_v37 = vsel %vm127_vm1, %v122_v33, 0  ;;  %473 = vst [vmem:[#allocation1] ss:$9 sm:$0xff] %v462_v19  ;;  %v693_v44 = vld [vmem:[#allocation11 + $0xd4] sm:$0xf]  ;;  %435 = vmatpush.bf16.msrb.mxu2 %v592_v34 }
  0x28   :  { %139 = vmatpush.bf16.msra.mxu0 %v128_v36  ;;  %152 = vmatpush.bf16.msra.mxu1 %v130_v37  ;;  %v645_v45 = vld [vmem:[#allocation11 + $0xd8] sm:$0xf0]  ;;  %v678_v46 = vld [vmem:[#allocation11 + $0x54] sm:$0xf0]  ;;  %v643_v47 = vld [vmem:[#allocation11 + $0xd0] sm:$0xf] }
  0x29   :  { %448 = vmatpush.bf16.msrb.mxu3 %v656_v35  ;;  %v694_v48 = vld [vmem:[#allocation11 + $0xd4] sm:$0xf0]  ;;  %v648_v50 = vor.u32 %v693_v44, %v645_v45  ;;  %v675_v51 = vld [vmem:[#allocation11 + $0x44] sm:$0xf]  ;;  %v573_v52 = vld [vmem:[#allocation11 + $0x48] sm:$0xf0]  ;;  %v580_v55 = vor.u32 %v678_v46, %v579_v43 }
  0x2a   :  { %v691_v53 = vld [vmem:[#allocation11 + $0xc4] sm:$0xf]  ;;  %v637_v54 = vld [vmem:[#allocation11 + $0xc8] sm:$0xf0]  ;;  %v644_v56 = vor.u32 %v694_v48, %v643_v47  ;;  %v571_v57 = vld [vmem:[#allocation11 + $0x40] sm:$0xf]  ;;  %v576_v61 = vor.u32 %v675_v51, %v573_v52 }
  0x2b   :  { %525 = vmatmul.msk.bf16.vlgmr.msra.gmra.mxu0 %vm123_vm2, %v115_v38  ;;  %526 = vmatmul.msk.bf16.vlgmr.msra.gmra.mxu1 %vm123_vm2, %v115_v38  ;;  %v676_v58 = vld [vmem:[#allocation11 + $0x44] sm:$0xf0]  ;;  %v635_v59 = vld [vmem:[#allocation11 + $0xc0] sm:$0xf]  ;;  %v640_v62 = vor.u32 %v691_v53, %v637_v54  ;;  %v673_v63 = vld [vmem:[#allocation11 + $0x34] sm:$0xf] }
  0x2c   :  { %408 = vmatpush.bf16.msrb.mxu0 %v596_v27  ;;  %421 = vmatpush.bf16.msrb.mxu1 %v660_v28  ;;  %v692_v60 = vld [vmem:[#allocation11 + $0xc4] sm:$0xf0]  ;;  %v565_v0 = vld [vmem:[#allocation11 + $0x38] sm:$0xf0]  ;;  %v689_v1 = vld [vmem:[#allocation11 + $0xb4] sm:$0xf]  ;;  %v572_v3 = vor.u32 %v676_v58, %v571_v57 }
  0x2d   :  { %436 = vmatpush.bf16.msrb.mxu2 %v584_v49  ;;  %449 = vmatpush.bf16.msrb.mxu3 %v648_v50  ;;  %v629_v2 = vld [vmem:[#allocation11 + $0xb8] sm:$0xf0]  ;;  %v636_v4 = vor.u32 %v692_v60, %v635_v59  ;;  %v563_v5 = vld [vmem:[#allocation11 + $0x30] sm:$0xf]  ;;  %v674_v6 = vld [vmem:[#allocation11 + $0x34] sm:$0xf0]  ;;  %v568_v9 = vor.u32 %v673_v63, %v565_v0 }
  0x2e   :  { %v627_v7 = vld [vmem:[#allocation11 + $0xb0] sm:$0xf]  ;;  %v690_v8 = vld [vmem:[#allocation11 + $0xb4] sm:$0xf0]  ;;  %v632_v10 = vor.u32 %v689_v1, %v629_v2  ;;  %v671_v11 = vld [vmem:[#allocation11 + $0x24] sm:$0xf]  ;;  %v564_v15 = vor.u32 %v674_v6, %v563_v5 }
  0x2f   :  { %v557_v12 = vld [vmem:[#allocation11 + $0x28] sm:$0xf0]  ;;  %v687_v13 = vld [vmem:[#allocation11 + $0xa4] sm:$0xf]  ;;  %v628_v16 = vor.u32 %v690_v8, %v627_v7  ;;  %v555_v17 = vld [vmem:[#allocation11 + $0x20] sm:$0xf] }
  0x30   :  { %409 = vmatpush.bf16.msrb.mxu0 %v588_v41  ;;  %422 = vmatpush.bf16.msrb.mxu1 %v652_v42  ;;  %v621_v14 = vld [vmem:[#allocation11 + $0xa8] sm:$0xf0]  ;;  %v672_v18 = vld [vmem:[#allocation11 + $0x24] sm:$0xf0]  ;;  %v619_v19 = vld [vmem:[#allocation11 + $0xa0] sm:$0xf]  ;;  %v560_v21 = vor.u32 %v671_v11, %v557_v12 }
  0x31   :  { %437 = vmatpush.bf16.msrb.mxu2 %v576_v61  ;;  %450 = vmatpush.bf16.msrb.mxu3 %v640_v62  ;;  %v688_v20 = vld [vmem:[#allocation11 + $0xa4] sm:$0xf0]  ;;  %v624_v22 = vor.u32 %v687_v13, %v621_v14  ;;  %v556_v23 = vor.u32 %v672_v18, %v555_v17  ;;  %v547_v25 = vld [vmem:[#allocation11 + $0x10] sm:$0xf]  ;;  %v670_v26 = vld [vmem:[#allocation11 + $0x14] sm:$0xf0] }
  0x32   :  { %v620_v24 = vor.u32 %v688_v20, %v619_v19  ;;  %v611_v27 = vld [vmem:[#allocation11 + $0x90] sm:$0xf]  ;;  %v548_v28 = vor.u32 %v670_v26, %v547_v25  ;;  %v686_v29 = vld [vmem:[#allocation11 + $0x94] sm:$0xf0]  ;;  %v669_v30 = vld [vmem:[#allocation11 + $0x14] sm:$0xf] }
  0x33   :  { %v612_v31 = vor.u32 %v686_v29, %v611_v27  ;;  %v549_v32 = vld [vmem:[#allocation11 + $0x18] sm:$0xf0]  ;;  %v685_v33 = vld [vmem:[#allocation11 + $0x94] sm:$0xf]  ;;  %v539_v37 = vld [vmem:[#allocation11] sm:$0xf] }
  0x34   :  { %410 = vmatpush.bf16.msrb.mxu0 %v580_v55  ;;  %423 = vmatpush.bf16.msrb.mxu1 %v644_v56  ;;  %v552_v34 = vor.u32 %v669_v30, %v549_v32  ;;  %v613_v35 = vld [vmem:[#allocation11 + $0x98] sm:$0xf0]  ;;  %v668_v38 = vld [vmem:[#allocation11 + $0x4] sm:$0xf0]  ;;  %v603_v39 = vld [vmem:[#allocation11 + $0x80] sm:$0xf] }
  0x35   :  { %438 = vmatpush.bf16.msrb.mxu2 %v568_v9  ;;  %451 = vmatpush.bf16.msrb.mxu3 %v632_v10  ;;  %v616_v36 = vor.u32 %v685_v33, %v613_v35  ;;  %v540_v40 = vor.u32 %v668_v38, %v539_v37  ;;  %v684_v41 = vld [vmem:[#allocation11 + $0x84] sm:$0xf0]  ;;  %v667_v42 = vld [vmem:[#allocation11 + $0x4] sm:$0xf]  ;;  %v541_v43 = vld [vmem:[#allocation11 + $0x8] sm:$0xf0] }
  0x36   :  { %v604_v44 = vor.u32 %v684_v41, %v603_v39  ;;  %v544_v45 = vor.u32 %v667_v42, %v541_v43  ;;  %v683_v46 = vld [vmem:[#allocation11 + $0x84] sm:$0xf]  ;;  %v605_v47 = vld [vmem:[#allocation11 + $0x88] sm:$0xf0]  ;;  %v198_v49 = vld [vmem:[#allocation9] sm:$0x3] }
  0x37   :  { %v608_v48 = vor.u32 %v683_v46, %v605_v47  ;;  %v200_v52 = vperm.slane %v198_v49, 0  ;;  %v201_v53 = vperm.slane %v198_v49, 1  ;;  %v872_v5 = vmov 0   ;;  %v242_v6 = vld [vmem:[%s966_s6] sm:$0x3]  ;;  %v475_v26 = vld [vmem:[#allocation1 + $0x9] sm:$0xff] }
  0x38   :  { %411 = vmatpush.bf16.msrb.mxu0 %v572_v3  ;;  %424 = vmatpush.bf16.msrb.mxu1 %v636_v4  ;;  %v465_v4 = vld [vmem:[#allocation2] sm:$0x1]  ;;  %v244_v7 = vperm.slane %v242_v6, 0  ;;  %v245_v12 = vperm.slane %v242_v6, 1  ;;  %s873_s6 = smov [#allocation12]   ;;  %vm504_vm3 = vcmask 57344  }
  0x39   :  { %439 = vmatpush.bf16.msrb.mxu2 %v560_v21  ;;  %452 = vmatpush.bf16.msrb.mxu3 %v624_v22  ;;  %v474_v22 = vld [vmem:[#allocation1] sm:$0xff]  ;;  %s511_s17 = sshll.u32 %s873_s6, 4  ;;  %s512_s17 = int_to_ptr.vmem [resolvable:$true] %s511_s17 }
  0x3a   :  { %710 = vset.pattern.permute.xlu0 %v872_v5 }
  0x3b   :  { %468 = vperm.xlu0 %710, %v465_v4  }
  0x3c   :  { %412 = vmatpush.bf16.msrb.mxu0 %v564_v15  ;;  %425 = vmatpush.bf16.msrb.mxu1 %v628_v16 }
  0x3d   :  { %440 = vmatpush.bf16.msrb.mxu2 %v552_v34  ;;  %453 = vmatpush.bf16.msrb.mxu3 %v616_v36 }
  0x40   :  { %413 = vmatpush.bf16.msrb.mxu0 %v556_v23  ;;  %426 = vmatpush.bf16.msrb.mxu1 %v620_v24 }
  0x41   :  { %441 = vmatpush.bf16.msrb.mxu2 %v544_v45  ;;  %454 = vmatpush.bf16.msrb.mxu3 %v608_v48 }
  0x44   :  { %414 = vmatpush.bf16.msrb.mxu0 %v548_v28  ;;  %427 = vmatpush.bf16.msrb.mxu1 %v612_v31 }
  0x48   :  { %415 = vmatpush.bf16.msrb.mxu0 %v540_v40  ;;  %428 = vmatpush.bf16.msrb.mxu1 %v604_v44 }
  0xa5   :  { %v181_v50 = vpop.f32.mrf.mxu2 }
  0xa6   :  { %v194_v51 = vpop.f32.mrf.mxu3 }
  0xa8   :  { %v141_v54 = vpop.f32.mrf.mxu0  ;;  %v154_v55 = vpop.f32.mrf.mxu1 }
  0xa9   :  { %v182_v56 = vadd.f32 %v181_v50, %v141_v54  ;;  %v195_v57 = vadd.f32 %v194_v51, %v154_v55 }
  0xab   :  { %v204_v58 = vadd.f32 %v200_v52, %v182_v56  ;;  %v205_v59 = vadd.f32 %v201_v53, %v195_v57 }
  0xad   :  { %v206_v60 = vmax.f32 %v204_v58, 0.0  ;;  %v207_v61 = vmax.f32 %v205_v59, 0.0  ;;  %v183_v62 = vpop.f32.mrf.mxu2  ;;  %v469_v27 = vpop.permute.xlu0 %468 }
  0xae   :  { %v196_v1 = vpop.f32.mrf.mxu3  ;;  %v471_v29 = vperm.slane %v469_v27, 0 }
  0xaf   :  { %v208_v63 = vpack.c.bf16 %v206_v60, %v206_v60  ;;  %v209_v0 = vpack.c.bf16 %v207_v61, %v207_v61 }
  0xb0   :  { %v143_v2 = vpop.f32.mrf.mxu0  ;;  %v156_v3 = vpop.f32.mrf.mxu1 }
  0xb1   :  { %416 = vmatmul.bf16.vlgmr.msrb.gmra.mxu0 %v208_v63  ;;  %429 = vmatmul.bf16.vlgmr.msrb.gmra.mxu1 %v209_v0 }
  0xb2   :  { %442 = vmatmul.bf16.vlgmr.msrb.gmra.mxu2 %v208_v63  ;;  %455 = vmatmul.bf16.vlgmr.msrb.gmra.mxu3 %v209_v0 }
 0x12e   :  { %v417_v8 = vpop.f32.mrf.mxu0  ;;  %v430_v9 = vpop.f32.mrf.mxu1 }
 0x12f   :  { %v418_v10 = vadd.f32 %v417_v8, %v244_v7 }
 0x131   :  { %v431_v11 = vadd.f32 %v430_v9, %v418_v10 }
 0x133   :  { %v460_v13 = vmax.f32 %v431_v11, 0.0 }
 0x135   :  { %v463_v14 = vpack.c.bf16 %v460_v13, %v460_v13  ;;  %v443_v15 = vpop.f32.mrf.mxu2  ;;  %v456_v16 = vpop.f32.mrf.mxu3 }
 0x136   :  { %v444_v17 = vadd.f32 %v443_v15, %v245_v12  ;;  %v419_v18 = vpop.f32.mrf.mxu0  ;;  %v432_v19 = vpop.f32.mrf.mxu1 }
 0x137   :  { %485 = vmatpush.bf16.xpose.msra.mxu0 %v463_v14 }
 0x138   :  { %v457_v20 = vadd.f32 %v456_v16, %v444_v17 }
 0x13a   :  { %v461_v21 = vmax.f32 %v457_v20, 0.0 }
 0x13c   :  { %v464_v23 = vpack.c.bf16 %v461_v21, %v461_v21 }
 0x13d   :  { %v445_v24 = vpop.f32.mrf.mxu2  ;;  %v458_v25 = vpop.f32.mrf.mxu3 }
 0x13e   :  { %498 = vmatpush.bf16.xpose.msra.mxu1 %v464_v23  ;;  %486 = vmatmul.bf16.vlgmr.msra.gmra.mxu0 %v474_v22 }
 0x145   :  { %499 = vmatmul.bf16.vlgmr.msra.gmra.mxu1 %v475_v26 }
 0x1bb   :  { %v487_v28 = vpop.f32.mrf.mxu0 }
 0x1bc   :  { %v488_v30 = vadd.f32 %v487_v28, %v471_v29 }
 0x1c2   :  { %v500_v31 = vpop.f32.mrf.mxu1 }
 0x1c3   :  { %v501_v32 = vadd.f32 %v500_v31, %v488_v30  ;;  %v489_v33 = vpop.f32.mrf.mxu0 }
 0x1c5   :  { %505 = vst.msk [vmem:[#allocation12] sm:$0x1] %vm504_vm3, %v501_v32 }
 0x1c6   :  { %516 = dma.vmem_to_hbm [thread:$0]  %s512_s17, 16, %s514_s19, [#allocation5]  }
 0x1ca   :  { %v502_v34 = vpop.f32.mrf.mxu1 }
 0x1cb   :  { %861 = dma.done.wait [#allocation5], 16  }
 0x1cc   :  { %862 = vsyncadd [#allocation5], 4294967280 }
 0x1cd   :  { %521 = vsyncpa [#allocation4], 1 }
 0x1ce   :  { %522 = vsyncpa [#allocation7], 1 }
 0x1cf   :  { %523 = vsyncpa [#allocation10], 1 }
 0x1d0   :  { %524 = vsyncpa [#allocation5], 1 }

</bundles_post_ra>
